<compile_context>
chip_gen: v7x
topology: tpu7x:2x2x1
jax: 0.10.0
libtpu: 0.0.40
codegen_flags: <defaults>
</compile_context>

<pallas_src>
import jax
import jax.numpy as jnp
from jax.experimental import pallas as pl
from jax.experimental.pallas import tpu as pltpu


# --------------------------------- kernels ---------------------------------- #

def _bahdanau_full_kernel(qb_ref, k_ref, ua_t_ref, va_ref, ctx_ref, w_ref):
    """One batch tile with the full sequence resident.

    qb_ref   : (Bt, 1, H) f32   Wa(query) + ba + bu (hoisted to the wrapper)
    k_ref    : (Bt, S, H) f32   keys tile
    ua_t_ref : (H, H)     f32   Ua^T (grid-invariant)
    va_ref   : (1, H)     f32   Va weight row (bias dropped: softmax is shift-invariant)
    ctx_ref  : (Bt, H)          context block of (B, 1, H) (middle dim squeezed)
    w_ref    : (Bt, S)          weights block of (B, 1, S) (middle dim squeezed)
    """
    Bt, S, H = k_ref.shape
    k = k_ref[...]

    # Ua(keys): fold (Bt, S) into the MXU M dimension. S % 8 == 0 keeps this reshape a free
    # relayout (true for the tested shapes; it is still correct, just slower, otherwise).
    kU = jnp.dot(k.reshape(Bt * S, H), ua_t_ref[...],
                 preferred_element_type=jnp.float32).reshape(Bt, S, H)

    # tanh(Wa(q) + Ua(k) + biases): qb already carries both Linear biases.
    h = jnp.tanh(qb_ref[...] + kU)                                   # (Bt, S, H) f32

    # Va projection (output width 1): VPU broadcast-multiply + lane reduce, not an N=1 MXU op.
    scores = jnp.sum(h * va_ref[...], axis=-1)                       # (Bt, S) f32

    # Softmax over the sequence axis (f32, max-subtracted, exact reciprocal).
    m = jnp.max(scores, axis=-1, keepdims=True)
    e = jnp.exp(scores - m)
    w = e * pl.reciprocal(jnp.sum(e, axis=-1, keepdims=True), approx=False)

    # context = weights @ keys with M = 1 per batch element: VPU multiply + sublane reduce.
    ctx = jnp.sum(w[:, :, None] * k, axis=1)                         # (Bt, H) f32

    ctx_ref[...] = ctx.astype(ctx_ref.dtype)
    w_ref[...] = w.astype(w_ref.dtype)


def _bahdanau_schunk_kernel(qb_ref, k_ref, ua_t_ref, va_ref, ctx_ref, sc_ref,
                            m_sc, l_sc, acc_sc):
    """S-chunked online-softmax variant: keys are streamed in (Bt, Sk, H) chunks.

    Raw scores are written per chunk; the context is accumulated flash-style and finalized
    on the last chunk. The (tiny) weights softmax runs in the wrapper.
    """
    s_idx = pl.program_id(1)

    @pl.when(s_idx == 0)
    def _():
        m_sc[...] = jnp.full_like(m_sc, -jnp.inf)
        l_sc[...] = jnp.zeros_like(l_sc)
        acc_sc[...] = jnp.zeros_like(acc_sc)

    Bt, Sk, H = k_ref.shape
    k = k_ref[...]
    kU = jnp.dot(k.reshape(Bt * Sk, H), ua_t_ref[...],
                 preferred_element_type=jnp.float32).reshape(Bt, Sk, H)
    h = jnp.tanh(qb_ref[...] + kU)
    scores = jnp.sum(h * va_ref[...], axis=-1)                       # (Bt, Sk) f32
    sc_ref[...] = scores.astype(sc_ref.dtype)                        # raw scores chunk out

    m_prev = m_sc[...]
    m_new = jnp.maximum(m_prev, jnp.max(scores, axis=-1, keepdims=True))
    alpha = jnp.exp(m_prev - m_new)                                  # (Bt, 1)
    p = jnp.exp(scores - m_new)                                      # (Bt, Sk)
    l_sc[...] = alpha * l_sc[...] + jnp.sum(p, axis=-1, keepdims=True)
    acc_sc[...] = alpha * acc_sc[...] + jnp.sum(p[:, :, None] * k, axis=1)
    m_sc[...] = m_new

    @pl.when(s_idx == pl.num_programs(1) - 1)
    def _():
        ctx_ref[...] = (acc_sc[...] *
                        pl.reciprocal(l_sc[...], approx=False)).astype(ctx_ref.dtype)


# ------------------------------ tile planning -------------------------------- #

_KEYS_BLOCK_TARGET = 2 * 1024 * 1024      # ~2 MiB of f32 keys per grid step
_VMEM_CEILING = 64 * 1024 * 1024          # stay under v7x's 64 MiB/TC


def _largest_divisor_leq(n, target):
    """Largest divisor of n that is <= target, preferring multiples of 8 (sublane-aligned)."""
    target = max(1, min(n, target))
    best, best8 = 1, 0
    for d in range(1, n + 1):
        if n % d == 0 and d <= target:
            best = d
            if d % 8 == 0:
                best8 = d
    return best8 if best8 else best


def _plan_tiles(B, S, H, s_chunk=None):
    """Pick (Bt, Sk). Sk == S selects the simple full-S kernel."""
    itemsize = 4
    if s_chunk is None:
        bt_min = min(B, 8)
        # Double-buffered keys block + the two live f32 intermediates (kU, h) ~= 4x the
        # keys block; chunk S if even a minimal batch tile overflows half the VMEM budget.
        if 4 * bt_min * S * H * itemsize > _VMEM_CEILING // 2:
            sk_target = max(8, _KEYS_BLOCK_TARGET // max(1, bt_min * H * itemsize))
            s_chunk = _largest_divisor_leq(S, sk_target)
        else:
            s_chunk = S
    Sk = s_chunk

    # Batch tile so the keys block is ~_KEYS_BLOCK_TARGET.
    bt = max(1, _KEYS_BLOCK_TARGET // max(1, Sk * H * itemsize))
    bt = min(bt, B)
    # Keep >= 2 batch tiles when B is big enough: lets v7x split the "parallel" axis over
    # its two TensorCores (near-free on single-TC v5e/v6e).
    if bt >= B and B >= 16:
        bt = (B + 1) // 2
    # Prefer a Bt that divides B so there is no ragged last block (ragged is still handled).
    for cand in range(bt, max(bt // 2, 1) - 1, -1):
        if B % cand == 0:
            bt = cand
            break
    return bt, Sk


def _vmem_limit(Bt, S, Sk, H, chunked):
    f32 = 4
    keys_blk = Bt * Sk * H * f32
    need = (2 * keys_blk                         # double-buffered keys DMA
            + 2 * Bt * H * f32                   # qb blocks
            + 2 * H * H * f32 + 2 * H * f32      # Ua^T, Va (grid-invariant)
            + 2 * keys_blk                       # live f32 intermediates (kU, h)
            + 2 * Bt * H * f32                   # context output block
            + 2 * Bt * (Sk if chunked else S) * f32)   # weights / raw-scores output block
    if chunked:
        need += Bt * (H + 2) * f32               # m, l, acc scratch
    need = int(need * 2) + (8 << 20)             # 2x margin + slack for Mosaic internals
    return max(32 << 20, min(need, _VMEM_CEILING))


# ------------------------------ pallas_call builders ------------------------- #

def _full_call(B, S, H, Bt, vmem_limit):
    grid_spec = pltpu.PrefetchScalarGridSpec(
        num_scalar_prefetch=0,
        grid=(pl.cdiv(B, Bt),),
        in_specs=[
            pl.BlockSpec((Bt, 1, H), lambda b: (b, 0, 0)),   # qb  (query proj + biases)
            pl.BlockSpec((Bt, S, H), lambda b: (b, 0, 0)),   # keys tile
            pl.BlockSpec((H, H), lambda b: (0, 0)),          # Ua^T (grid-invariant)
            pl.BlockSpec((1, H), lambda b: (0, 0)),          # Va row (grid-invariant)
        ],
        out_specs=[
            pl.BlockSpec((Bt, None, H), lambda b: (b, 0, 0)),   # context (B, 1, H)
            pl.BlockSpec((Bt, None, S), lambda b: (b, 0, 0)),   # weights (B, 1, S)
        ],
    )
    return pl.pallas_call(
        _bahdanau_full_kernel,
        out_shape=(jax.ShapeDtypeStruct((B, 1, H), jnp.float32),
                   jax.ShapeDtypeStruct((B, 1, S), jnp.float32)),
        grid_spec=grid_spec,
        compiler_params=pltpu.CompilerParams(
            dimension_semantics=("parallel",),
            vmem_limit_bytes=vmem_limit),
    )


def _schunk_call(B, S, H, Bt, Sk, vmem_limit):
    grid_spec = pltpu.PrefetchScalarGridSpec(
        num_scalar_prefetch=0,
        grid=(pl.cdiv(B, Bt), S // Sk),
        in_specs=[
            pl.BlockSpec((Bt, 1, H), lambda b, s: (b, 0, 0)),    # qb
            pl.BlockSpec((Bt, Sk, H), lambda b, s: (b, s, 0)),   # keys chunk
            pl.BlockSpec((H, H), lambda b, s: (0, 0)),           # Ua^T
            pl.BlockSpec((1, H), lambda b, s: (0, 0)),           # Va row
        ],
        out_specs=[
            pl.BlockSpec((Bt, None, H), lambda b, s: (b, 0, 0)),    # context (resident over s)
            pl.BlockSpec((Bt, None, Sk), lambda b, s: (b, 0, s)),   # raw scores chunk
        ],
        scratch_shapes=[
            pltpu.VMEM((Bt, 1), jnp.float32),    # running max
            pltpu.VMEM((Bt, 1), jnp.float32),    # running sum
            pltpu.VMEM((Bt, H), jnp.float32),    # context accumulator
        ],
    )
    return pl.pallas_call(
        _bahdanau_schunk_kernel,
        out_shape=(jax.ShapeDtypeStruct((B, 1, H), jnp.float32),
                   jax.ShapeDtypeStruct((B, 1, S), jnp.float32)),
        grid_spec=grid_spec,
        compiler_params=pltpu.CompilerParams(
            dimension_semantics=("parallel", "arbitrary"),
            vmem_limit_bytes=vmem_limit),
    )


# ---------------------------------- wrapper ---------------------------------- #

def bahdanau_attention(query, keys, params, *, s_chunk=None):
    """query: (B, 1, H) f32; keys: (B, S, H) or (S, H) f32 ->
    (context (B, 1, H), weights (B, 1, S)) — matches the PyTorch module's forward."""
    if keys.ndim == 2:                      # mirrors the `keys.dim() == 2` unsqueeze
        keys = keys[None]
    B, Tq, H = query.shape
    _, S, _ = keys.shape
    assert Tq == 1, "kernel implements the standard decoder-step case (query length 1)"

    wa, ba, ua, bu, va, bv = params
    del bv  # softmax is shift-invariant: Va's bias cannot change weights or context

    # Hoist the query projection: one batched XLA matmul; fuse both Linear biases into it.
    qb = (jnp.dot(query.reshape(B, H), wa.T,
                  precision=jax.lax.Precision.HIGHEST) + (ba + bu))
    qb = qb.reshape(B, 1, H).astype(jnp.float32)
    ua_t = jnp.asarray(ua, jnp.float32).T                 # (H, H)
    va_row = jnp.asarray(va, jnp.float32).reshape(1, H)

    # Keys stay f32 and unpadded: a wrapper-side cast or jnp.pad would add an extra full
    # HBM pass over the dominant input of a keys-bandwidth-bound kernel.
    keys_f32 = jnp.asarray(keys, jnp.float32)

    Bt, Sk = _plan_tiles(B, S, H, s_chunk)
    if Sk != S and S % Sk != 0:
        Sk = _largest_divisor_leq(S, Sk)

    # TODO(synk): for sub-128 S/H, pad the output lane dims to 128 (unmasked vst) and pad
    # Ua^T's output dim to an MXU-friendly multiple of 128/256 — small wins, skipped to keep
    # the wrapper free of extra passes over the (EUP-bound) outputs/params.
    if Sk == S:
        vmem_limit = _vmem_limit(Bt, S, Sk, H, chunked=False)
        ctx, w = _full_call(B, S, H, Bt, vmem_limit)(qb, keys_f32, ua_t, va_row)
    else:
        vmem_limit = _vmem_limit(Bt, S, Sk, H, chunked=True)
        ctx, scores = _schunk_call(B, S, H, Bt, Sk, vmem_limit)(qb, keys_f32, ua_t, va_row)
        # Raw scores are exact; normalizing the tiny (B, 1, S) slab in XLA is negligible
        # next to the keys stream and keeps the kernel a single pass over keys.
        w = jax.nn.softmax(scores, axis=-1)
    return ctx, w


# ----------------------------- reference / test ------------------------------ #

def init_params(key, hidden_size):
    """Deterministic synthetic parameters matching nn.Linear shapes (weight: (out, in))."""
    k1, k2, k3, k4, k5, k6 = jax.random.split(key, 6)
    s = 1.0 / jnp.sqrt(hidden_size)
    wa = jax.random.uniform(k1, (hidden_size, hidden_size), jnp.float32, -s, s)
    ba = jax.random.uniform(k2, (hidden_size,), jnp.float32, -s, s)
    ua = jax.random.uniform(k3, (hidden_size, hidden_size), jnp.float32, -s, s)
    bu = jax.random.uniform(k4, (hidden_size,), jnp.float32, -s, s)
    va = jax.random.uniform(k5, (1, hidden_size), jnp.float32, -s, s)
    bv = jax.random.uniform(k6, (1,), jnp.float32, -s, s)
    return wa, ba, ua, bu, va, bv


def reference(query, keys, params):
    wa, ba, ua, bu, va, bv = params
    scores = jnp.einsum("bsh,oh->bso", jnp.tanh(
        jnp.einsum("bqh,oh->bqo", query, wa) + ba +
        jnp.einsum("bsh,oh->bso", keys, ua) + bu), va) + bv          # (B, S, 1)
    scores = jnp.transpose(scores, (0, 2, 1))                         # (B, 1, S)
    weights = jax.nn.softmax(scores, axis=-1)
    context = jnp.einsum("bqs,bsh->bqh", weights, keys)
    return context, weights


if __name__ == "__main__":
    # Full-f32 XLA matmuls so the reference matches the kernel's f32 MXU path.
    jax.config.update("jax_default_matmul_precision", "highest")

    key = jax.random.PRNGKey(0)
    H = 32

    cases = [
        dict(B=2, S=8, s_chunk=None),    # single batch tile, full-S kernel
        dict(B=20, S=8, s_chunk=None),   # two batch tiles (Bt=10), full-S kernel
        dict(B=4, S=64, s_chunk=16),     # forced S-chunked online-softmax path
    ]
    for i, case in enumerate(cases):
        B, S, s_chunk = case["B"], case["S"], case["s_chunk"]
        kq, kk, kp = jax.random.split(jax.random.fold_in(key, i), 3)
        query = jax.random.normal(kq, (B, 1, H), jnp.float32)
        keys = jax.random.normal(kk, (B, S, H), jnp.float32)
        params = init_params(kp, H)

        ctx, w = bahdanau_attention(query, keys, params, s_chunk=s_chunk)
        jax.block_until_ready((ctx, w))

        ctx_exp, w_exp = reference(query, keys, params)
        assert ctx.shape == (B, 1, H) and w.shape == (B, 1, S), f"bad shapes {case}"
        assert jnp.allclose(ctx, ctx_exp, atol=3e-5, rtol=3e-5), f"context mismatch {case}"
        assert jnp.allclose(w, w_exp, atol=3e-5, rtol=3e-5), f"weights mismatch {case}"

    print("KERNEL_OK")
</pallas_src>

<mosaic_0001>
module attributes {stable_mosaic.version = 11 : i64} {
  func.func @_bahdanau_full_kernel(%arg0: i32, %arg1: memref<2x1x32xf32, #tpu.memory_space<vmem>>, %arg2: memref<2x8x32xf32, #tpu.memory_space<vmem>>, %arg3: memref<32x32xf32, #tpu.memory_space<vmem>>, %arg4: memref<1x32xf32, #tpu.memory_space<vmem>>, %arg5: memref<2x1x32xf32, #tpu.memory_space<vmem>>, %arg6: memref<2x1x8xf32, #tpu.memory_space<vmem>>) attributes {dimension_semantics = [#tpu.dimension_semantics<parallel>], iteration_bounds = array<i64: 1>, scalar_prefetch = 0 : i64, scratch_operands = 0 : i64, tpu.core_type = #tpu.core_type<tc>, window_params = [{transform_indices = @transform_0, window_bounds = array<i64: 2, 1, 32>}, {transform_indices = @transform_1, window_bounds = array<i64: 2, 8, 32>}, {pipeline_mode = #tpu.pipeline_mode<synchronous>, transform_indices = @transform_2, window_bounds = array<i64: 32, 32>}, {pipeline_mode = #tpu.pipeline_mode<synchronous>, transform_indices = @transform_3, window_bounds = array<i64: 1, 32>}, {transform_indices = @transform_4, window_bounds = array<i64: 2, 1, 32>}, {transform_indices = @transform_5, window_bounds = array<i64: 2, 1, 8>}]} {
    %c0 = arith.constant 0 : index
    %c0_0 = arith.constant 0 : index
    %c0_1 = arith.constant 0 : index
    %0 = vector.load %arg2[%c0, %c0_0, %c0_1] : memref<2x8x32xf32, #tpu.memory_space<vmem>>, vector<2x8x32xf32>
    %1 = vector.shape_cast %0 : vector<2x8x32xf32> to vector<16x32xf32>
    %c0_2 = arith.constant 0 : index
    %c0_3 = arith.constant 0 : index
    %2 = vector.load %arg3[%c0_2, %c0_3] : memref<32x32xf32, #tpu.memory_space<vmem>>, vector<32x32xf32>
    %cst = arith.constant dense<0.000000e+00> : vector<16x32xf32>
    %3 = tpu.matmul %1, %2, %cst {dimension_numbers = #tpu.dot_dimension_numbers<[1], [0], [0], [1], [0, 0, 1, 1], [], []>, precision = #tpu.contract_precision<fp32>} : vector<16x32xf32>, vector<32x32xf32>, vector<16x32xf32> -> vector<16x32xf32>
    %4 = vector.shape_cast %3 : vector<16x32xf32> to vector<2x8x32xf32>
    %c0_4 = arith.constant 0 : index
    %c0_5 = arith.constant 0 : index
    %c0_6 = arith.constant 0 : index
    %5 = vector.load %arg1[%c0_4, %c0_5, %c0_6] : memref<2x1x32xf32, #tpu.memory_space<vmem>>, vector<2x1x32xf32>
    %6 = vector.broadcast %5 : vector<2x1x32xf32> to vector<2x8x32xf32>
    %7 = arith.addf %6, %4 : vector<2x8x32xf32>
    %8 = math.tanh %7 : vector<2x8x32xf32>
    %c0_7 = arith.constant 0 : index
    %c0_8 = arith.constant 0 : index
    %9 = vector.load %arg4[%c0_7, %c0_8] : memref<1x32xf32, #tpu.memory_space<vmem>>, vector<1x32xf32>
    %10 = vector.shape_cast %9 : vector<1x32xf32> to vector<1x1x32xf32>
    %11 = vector.broadcast %10 : vector<1x1x32xf32> to vector<2x8x32xf32>
    %12 = arith.mulf %8, %11 : vector<2x8x32xf32>
    %cst_9 = arith.constant dense<0.000000e+00> : vector<2x8xf32>
    %13 = vector.multi_reduction <add>, %12, %cst_9 [2] : vector<2x8x32xf32> to vector<2x8xf32>
    %cst_10 = arith.constant dense<0xFF800000> : vector<2xf32>
    %14 = vector.multi_reduction <maximumf>, %13, %cst_10 [1] : vector<2x8xf32> to vector<2xf32>
    %15 = vector.shape_cast %14 : vector<2xf32> to vector<2x1xf32>
    %16 = vector.broadcast %15 : vector<2x1xf32> to vector<2x8xf32>
    %17 = arith.subf %13, %16 : vector<2x8xf32>
    %18 = math.exp %17 : vector<2x8xf32>
    %cst_11 = arith.constant dense<0.000000e+00> : vector<2xf32>
    %19 = vector.multi_reduction <add>, %18, %cst_11 [1] : vector<2x8xf32> to vector<2xf32>
    %20 = vector.shape_cast %19 : vector<2xf32> to vector<2x1xf32>
    %21 = tpu.reciprocal %20 : vector<2x1xf32> -> vector<2x1xf32>
    %22 = vector.broadcast %21 : vector<2x1xf32> to vector<2x8xf32>
    %23 = arith.mulf %18, %22 : vector<2x8xf32>
    %24 = vector.shape_cast %23 : vector<2x8xf32> to vector<2x8x1xf32>
    %25 = vector.broadcast %24 : vector<2x8x1xf32> to vector<2x8x32xf32>
    %26 = arith.mulf %25, %0 : vector<2x8x32xf32>
    %cst_12 = arith.constant dense<0.000000e+00> : vector<2x32xf32>
    %27 = vector.multi_reduction <add>, %26, %cst_12 [1] : vector<2x8x32xf32> to vector<2x32xf32>
    %c0_13 = arith.constant 0 : index
    %c0_14 = arith.constant 0 : index
    %c0_15 = arith.constant 0 : index
    %28 = vector.load %arg5[%c0_13, %c0_14, %c0_15] : memref<2x1x32xf32, #tpu.memory_space<vmem>>, vector<2x1x32xf32>
    %29 = vector.shape_cast %28 : vector<2x1x32xf32> to vector<2x32xf32>
    %30 = vector.shape_cast %27 : vector<2x32xf32> to vector<2x1x32xf32>
    tpu.vector_store %arg5[%c0_13, %c0_14, %c0_15], %30 {strides = array<i32>} : memref<2x1x32xf32, #tpu.memory_space<vmem>>, vector<2x1x32xf32>,
    %c0_16 = arith.constant 0 : index
    %c0_17 = arith.constant 0 : index
    %c0_18 = arith.constant 0 : index
    %31 = vector.load %arg6[%c0_16, %c0_17, %c0_18] : memref<2x1x8xf32, #tpu.memory_space<vmem>>, vector<2x1x8xf32>
    %32 = vector.shape_cast %31 : vector<2x1x8xf32> to vector<2x8xf32>
    %33 = vector.shape_cast %23 : vector<2x8xf32> to vector<2x1x8xf32>
    tpu.vector_store %arg6[%c0_16, %c0_17, %c0_18], %33 {strides = array<i32>} : memref<2x1x8xf32, #tpu.memory_space<vmem>>, vector<2x1x8xf32>,
    return
  }
  func.func @transform_0(%arg0: i32) -> (i32, i32, i32) {
    %c0_i32 = arith.constant 0 : i32
    %c0_i32_0 = arith.constant 0 : i32
    %c0_i32_1 = arith.constant 0 : i32
    return %arg0, %c0_i32, %c0_i32_0 : i32, i32, i32
  }
  func.func @transform_1(%arg0: i32) -> (i32, i32, i32) {
    %c0_i32 = arith.constant 0 : i32
    %c0_i32_0 = arith.constant 0 : i32
    %c0_i32_1 = arith.constant 0 : i32
    return %arg0, %c0_i32, %c0_i32_0 : i32, i32, i32
  }
  func.func @transform_2(%arg0: i32) -> (i32, i32) {
    %c0_i32 = arith.constant 0 : i32
    %c0_i32_0 = arith.constant 0 : i32
    %c0_i32_1 = arith.constant 0 : i32
    return %c0_i32, %c0_i32_0 : i32, i32
  }
  func.func @transform_3(%arg0: i32) -> (i32, i32) {
    %c0_i32 = arith.constant 0 : i32
    %c0_i32_0 = arith.constant 0 : i32
    %c0_i32_1 = arith.constant 0 : i32
    return %c0_i32, %c0_i32_0 : i32, i32
  }
  func.func @transform_4(%arg0: i32) -> (i32, i32, i32) {
    %c0_i32 = arith.constant 0 : i32
    %c0_i32_0 = arith.constant 0 : i32
    %c0_i32_1 = arith.constant 0 : i32
    return %arg0, %c0_i32, %c0_i32_0 : i32, i32, i32
  }
  func.func @transform_5(%arg0: i32) -> (i32, i32, i32) {
    %c0_i32 = arith.constant 0 : i32
    %c0_i32_0 = arith.constant 0 : i32
    %c0_i32_1 = arith.constant 0 : i32
    return %arg0, %c0_i32, %c0_i32_0 : i32, i32, i32
  }
}

</mosaic_0001>

<bundles_post_ra>
// kernel: tpu_custom_call.1
= control target key start
LH: loop header
LB: loop body
LE: loop exit
PB: predicated region body
PF: predicated region fallthrough
CT: control target
= control target key end

     0   :  { %11 = vsyncpa [#allocation3], 0  ;;  %s1234_s0 = inlined_call_operand.hbm [shape: f32[2,1,32], index: 0, kind: input, shape index: {}]   ;;  %s1235_s1 = inlined_call_operand.hbm [shape: f32[2,8,32], index: 1, kind: input, shape index: {}]   ;;  %s1236_s2 = inlined_call_operand.hbm [shape: f32[32,32], index: 2, kind: input, shape index: {}]   ;;  %s1237_s3 = inlined_call_operand.vmem [shape: f32[1,32], index: 3, kind: input, shape index: {}]   ;;  %s1238_s4 = inlined_call_operand.hbm [shape: f32[2,1,32], index: 4, kind: output, shape index: {0}]   ;;  %s1239_s5 = inlined_call_operand.hbm [shape: f32[2,1,8], index: 5, kind: output, shape index: {1}]  }
   0x1   :  { %12 = vsyncpa [#allocation6], 0 }
   0x2   :  { %13 = vsyncpa [#allocation4], 0 }
   0x3   :  { %14 = vsyncpa [#allocation10], 0  ;;  %s1086_s18 = smov [#allocation5]   ;;  %s968_s22 = scalar_lea.hbm %s1235_s1, 256 }
   0x4   :  { %s32_s19 = sshll.u32 %s1086_s18, 4  ;;  %p969_p0 = scmp.ne.s32.totalorder %s1235_s1, %s968_s22  ;;  %s33_s19 = int_to_ptr.vmem [resolvable:$true] %s32_s19 }
   0x5   :  { %p972_p1 = scmp.lt.u32.totalorder %s968_s22, %s1235_s1 }
   0x7   :  { %p974_p2 = pnand %p972_p1, %p969_p0 }
   0x9   :  { %977 = shalt.err (!%p974_p2)
}
   0xa   :  { %s978_s27 = scalar_lea.vmem %s33_s19, 256  ;;  %p983_p4 = scmp.lt.s32.totalorder %s33_s19, %s33_s19 }
   0xb   :  { %p979_p3 = scmp.ne.s32.totalorder %s33_s19, %s978_s27  ;;  %p984_p5 = scmp.lt.s32.totalorder %s978_s27, %s978_s27 }
   0xd   :  { %p985_p6 = por %p984_p5, %p983_p4 }
   0xf   :  { %p986_p7 = pnand %p985_p6, %p979_p3 }
  0x11   :  { %989 = shalt.err (!%p986_p7)
}
  0x12   :  { %s1087_s28 = smov 128   ;;  %s1088_s29 = smov 8  }
  0x13   :  { %38 = dma.hbm_to_vmem [thread:$0]  %s1235_s1, 256, %s33_s19, [#allocation6], %s1087_s28, %s1087_s28, %s1088_s29  }
  0x14   :  { %s1089_s7 = smov [#allocation2]   ;;  %s990_s11 = scalar_lea.hbm %s1234_s0, 32 }
  0x15   :  { %s20_s8 = sshll.u32 %s1089_s7, 4  ;;  %p991_p8 = scmp.ne.s32.totalorder %s1234_s0, %s990_s11  ;;  %s21_s8 = int_to_ptr.vmem [resolvable:$true] %s20_s8 }
  0x16   :  { %p994_p9 = scmp.lt.u32.totalorder %s990_s11, %s1234_s0 }
  0x18   :  { %p996_p10 = pnand %p994_p9, %p991_p8 }
  0x1a   :  { %999 = shalt.err (!%p996_p10)
}
  0x1b   :  { %s1000_s16 = scalar_lea.vmem %s21_s8, 32  ;;  %p1005_p12 = scmp.lt.s32.totalorder %s21_s8, %s21_s8 }
  0x1c   :  { %p1001_p11 = scmp.ne.s32.totalorder %s21_s8, %s1000_s16  ;;  %p1006_p13 = scmp.lt.s32.totalorder %s1000_s16, %s1000_s16 }
  0x1e   :  { %p1007_p0 = por %p1006_p13, %p1005_p12 }
  0x20   :  { %p1008_p1 = pnand %p1007_p0, %p1001_p11 }
  0x22   :  { %1011 = shalt.err (!%p1008_p1)
}
  0x23   :  { %s1090_s1 = smov 16   ;;  %s1091_s17 = smov 1  }
  0x24   :  { %26 = dma.hbm_to_vmem [thread:$0]  %s1234_s0, 32, %s21_s8, [#allocation3], %s1090_s1, %s1090_s1, %s1091_s17  }
  0x25   :  { %s1092_s20 = smov [#allocation7]   ;;  %s1012_s24 = scalar_lea.hbm %s1236_s2, 512 }
  0x26   :  { %s44_s21 = sshll.u32 %s1092_s20, 4  ;;  %p1013_p2 = scmp.ne.s32.totalorder %s1236_s2, %s1012_s24  ;;  %s45_s21 = int_to_ptr.vmem [resolvable:$true] %s44_s21 }
  0x27   :  { %p1016_p3 = scmp.lt.u32.totalorder %s1012_s24, %s1236_s2 }
  0x29   :  { %p1018_p4 = pnand %p1016_p3, %p1013_p2 }
  0x2b   :  { %1021 = shalt.err (!%p1018_p4)
}
  0x2c   :  { %s1022_s6 = scalar_lea.vmem %s45_s21, 512  ;;  %p1027_p6 = scmp.lt.s32.totalorder %s45_s21, %s45_s21 }
  0x2d   :  { %p1023_p5 = scmp.ne.s32.totalorder %s45_s21, %s1022_s6  ;;  %p1028_p7 = scmp.lt.s32.totalorder %s1022_s6, %s1022_s6 }
  0x2f   :  { %p1029_p8 = por %p1028_p7, %p1027_p6 }
  0x31   :  { %p1030_p9 = pnand %p1029_p8, %p1023_p5 }
  0x33   :  { %1033 = shalt.err (!%p1030_p9)
}
  0x34   :  { %50 = dma.hbm_to_vmem [thread:$0]  %s1236_s2, 512, %s45_s21, [#allocation6], %s1087_s28, %s1087_s28, %s1088_s29  }
  0x35   :  { %1078 = dma.done.wait [#allocation3], 32  }
  0x36   :  { %1079 = vsyncadd [#allocation3], 4294967264 }
  0x37   :  { %1080 = dma.done.wait [#allocation6], 768  }
  0x38   :  { %1081 = vsyncadd [#allocation6], 4294966528  ;;  %vm68_vm0 = vcmask 261120   ;;  %v64_v0 = vld [vmem:[#allocation7] sm:$0xff]  ;;  %v65_v1 = vld [vmem:[#allocation7 + $0x8] sm:$0xff]  ;;  %v638_v63 = vlaneseq  ;;  %vm648_vm1 = vcmask 1041409  }
  0x39   :  { %v66_v2 = vld [vmem:[#allocation7 + $0x10] sm:$0xff]  ;;  %v76_v3 = vand.u32 4294901760, %v64_v0  ;;  %v79_v4 = vand.u32 4294901760, %v65_v1  ;;  %v67_v5 = vld [vmem:[#allocation7 + $0x18] sm:$0xff]  ;;  %v784_v48 = vld [vmem:[#allocation2 + $0x1] ss:$0 sm:$0xff] }
  0x3a   :  { %v82_v6 = vand.u32 4294901760, %v66_v2  ;;  %v1171_v7 = vld [vmem:[#allocation5] sm:$0xff]  ;;  %v1173_v8 = vld [vmem:[#allocation5 + $0x8] sm:$0xff]  ;;  %v85_v9 = vand.u32 4294901760, %v67_v5  ;;  %v783_v52 = vld [vmem:[#allocation2] ss:$0 sm:$0xff] }
  0x3b   :  { %v70_v10 = vsel %vm68_vm0, %v1171_v7, 0  ;;  %v73_v11 = vsel %vm68_vm0, %v1173_v8, 0  ;;  %v888_v12 = vpack.c.bf16 %v79_v4, %v76_v3  ;;  %v166_v15 = vsub.f32 %v64_v0, %v76_v3  ;;  %v785_v56 = vld [vmem:[%s1237_s3] ss:$0 sm:$0xff]  ;;  %s1094_s3 = smov [#allocation9]  }
  0x3c   :  { %v1179_v13 = vand.u32 4294901760, %v70_v10  ;;  %v1181_v14 = vand.u32 4294901760, %v73_v11  ;;  %v892_v16 = vpack.c.bf16 %v85_v9, %v82_v6  ;;  %v173_v17 = vsub.f32 %v65_v1, %v79_v4  ;;  %s766_s29 = sshll.u32 %s1094_s3, 4  ;;  %s767_s29 = int_to_ptr.vmem [resolvable:$true] %s766_s29 }
  0x3d   :  { %v180_v18 = vsub.f32 %v66_v2, %v82_v6  ;;  %v187_v19 = vsub.f32 %v67_v5, %v85_v9  ;;  %889 = vmatprep.subr.bf16.mxu1 %v888_v12  ;;  %913 = vmatprep.subr.bf16.mxu0 %v888_v12  ;;  %v167_v22 = vand.u32 4294901760, %v166_v15  ;;  %v639_v0 = vand.u32 127, %v638_v63  ;;  %s1034_s8 = scalar_lea.vmem %s767_s29, 32  ;;  %p1039_p11 = scmp.lt.s32.totalorder %s767_s29, %s767_s29 }
  0x3e   :  { %v145_v20 = vsub.f32 %v70_v10, %v1179_v13  ;;  %v155_v21 = vsub.f32 %v73_v11, %v1181_v14  ;;  %891 = vmatpush3.bf16.msra.mxu1 %v888_v12  ;;  %915 = vmatpush3.bf16.msra.mxu0 %v888_v12  ;;  %v174_v23 = vand.u32 4294901760, %v173_v17  ;;  %v904_v44 = vpack.c.bf16 %v173_v17, %v166_v15  ;;  %p1035_p10 = scmp.ne.s32.totalorder %s767_s29, %s1034_s8  ;;  %p1040_p12 = scmp.lt.s32.totalorder %s1034_s8, %s1034_s8 }
  0x3f   :  { %v181_v24 = vand.u32 4294901760, %v180_v18  ;;  %v188_v25 = vand.u32 4294901760, %v187_v19  ;;  %893 = vmatprep.subr.bf16.mxu1 %v892_v16  ;;  %917 = vmatprep.subr.bf16.mxu0 %v892_v16  ;;  %v168_v28 = vsub.f32 %v166_v15, %v167_v22  ;;  %v908_v45 = vpack.c.bf16 %v187_v19, %v180_v18 }
  0x40   :  { %v146_v26 = vand.u32 4294901760, %v145_v20  ;;  %v156_v27 = vand.u32 4294901760, %v155_v21  ;;  %v175_v29 = vsub.f32 %v173_v17, %v174_v23  ;;  %v920_v30 = vpack.c.bf16 %v174_v23, %v167_v22  ;;  %p1041_p13 = por %p1040_p12, %p1039_p11 }
  0x41   :  { %v182_v31 = vsub.f32 %v180_v18, %v181_v24  ;;  %v189_v32 = vsub.f32 %v187_v19, %v188_v25  ;;  %v169_v35 = vand.u32 4294901760, %v168_v28  ;;  %v924_v43 = vpack.c.bf16 %v188_v25, %v181_v24 }
  0x42   :  { %v147_v33 = vsub.f32 %v145_v20, %v146_v26  ;;  %863 = vmatprep.mubr.f32.mxu0 %v146_v26  ;;  %v157_v34 = vsub.f32 %v155_v21, %v156_v27  ;;  %895 = vmatpush3.bf16.msra.mxu1 %v892_v16  ;;  %v176_v36 = vand.u32 4294901760, %v175_v29  ;;  %v641_v1 = vshrl.u32 %v638_v63, 7  ;;  %p1042_p0 = pnand %p1041_p13, %p1035_p10 }
  0x43   :  { %919 = vmatpush3.bf16.msra.mxu0 %v892_v16  ;;  %v183_v37 = vand.u32 4294901760, %v182_v31  ;;  %v190_v38 = vand.u32 4294901760, %v189_v32  ;;  %vm651_vm2 = vcmask 58368   ;;  %v1093_v11 = vmov 0  }
  0x44   :  { %v148_v39 = vand.u32 4294901760, %v147_v33  ;;  %v158_v40 = vand.u32 4294901760, %v157_v34  ;;  %921 = vmatprep.subr.bf16.mxu0 %v920_v30  ;;  %v896_v41 = vpack.c.bf16 %v176_v36, %v169_v35  ;;  %v642_v3 = vsub.s32 %v639_v0, %v641_v1  ;;  %957 = vset.pattern.permute.xlu0 %v1093_v11 }
  0x45   :  { %v900_v42 = vpack.c.bf16 %v190_v38, %v183_v37  ;;  %956 = vset.pattern.permute.xlu1 %v1093_v11  ;;  %vm746_vm3 = vcmask 57344  }
  0x46   :  { %830 = vmatprep.mubr.f32.mxu1 %v148_v39  ;;  %864 = vmatmul.mubr.f32.vlgmr.msra.gmra.mrb[0].mxu0 %v156_v27 }
  0x47   :  { %831 = vmatmul.mubr.f32.vlgmr.msra.gmra.mrb[0].mxu1 %v158_v40  ;;  %897 = vmatprep.subr.bf16.mxu1 %v896_v41 }
  0x48   :  { %899 = vmatpush3.bf16.msra.mxu1 %v896_v41  ;;  %923 = vmatpush3.bf16.msra.mxu0 %v920_v30 }
  0x49   :  { %901 = vmatprep.subr.bf16.mxu1 %v900_v42  ;;  %925 = vmatprep.subr.bf16.mxu0 %v924_v43 }
  0x4a   :  { %841 = vmatprep.mubr.f32.mxu1 %v1179_v13  ;;  %874 = vmatprep.mubr.f32.mxu0 %v1179_v13 }
  0x4c   :  { %903 = vmatpush3.bf16.msra.mxu1 %v900_v42  ;;  %927 = vmatpush3.bf16.msra.mxu0 %v924_v43 }
  0x4d   :  { %905 = vmatprep.subr.bf16.mxu1 %v904_v44  ;;  %929 = vmatprep.subr.bf16.mxu0 %v888_v12 }
  0x4f   :  { %842 = vmatmul.mubr.f32.vlgmr.msra.gmra.mrb[0].mxu1 %v1181_v14  ;;  %875 = vmatmul.mubr.f32.vlgmr.msra.gmra.mrb[0].mxu0 %v1181_v14 }
  0x50   :  { %907 = vmatpush3.bf16.msra.mxu1 %v904_v44  ;;  %931 = vmatpush3.bf16.msra.mxu0 %v888_v12  ;;  %v658_v12 = vsub.s32 0, %v641_v1 }
  0x51   :  { %909 = vmatprep.subr.bf16.mxu1 %v908_v45  ;;  %933 = vmatprep.subr.bf16.mxu0 %v892_v16 }
  0x52   :  { %852 = vmatprep.mubr.f32.mxu1 %v145_v20  ;;  %885 = vmatprep.mubr.f32.mxu0 %v1179_v13  ;;  %v662_v13 = vsub.s32 1, %v641_v1 }
  0x54   :  { %911 = vmatpush3.bf16.msra.mxu1 %v908_v45  ;;  %935 = vmatpush3.bf16.msra.mxu0 %v892_v16 }
  0x57   :  { %853 = vmatmul.mubr.f32.vlgmr.msra.gmra.mrb[0].mxu1 %v155_v21  ;;  %886 = vmatmul.mubr.f32.vlgmr.msra.gmra.mrb[0].mxu0 %v1181_v14 }
 0x12a   :  { %v854_v46 = vpop.f32.mrb[0].mxu1  ;;  %v887_v47 = vpop.f32.mrb[0].mxu0 }
 0x12b   :  { %v936_v49 = vadd.f32 %v887_v47, %v854_v46  ;;  %v337_v50 = vpop.f32.mrb[1].mxu1  ;;  %v593_v51 = vpop.f32.mrb[1].mxu0 }
 0x12c   :  { %v937_v53 = vadd.f32 %v593_v51, %v337_v50 }
 0x12d   :  { %v618_v54 = vadd.f32 %v936_v49, %v784_v48 }
 0x12e   :  { %v617_v55 = vadd.f32 %v937_v53, %v783_v52 }
 0x12f   :  { %958 = vtanh.f32 %v618_v54 }
 0x130   :  { %960 = vtanh.f32 %v617_v55 }
 0x139   :  { %v959_v57 = vpop.eup %958 }
 0x13a   :  { %v961_v58 = vpop.eup %960  ;;  %v629_v61 = vmul.f32 %v959_v57, %v785_v56 }
 0x13b   :  { %v628_v59 = vmul.f32 %v961_v58, %v785_v56 }
 0x13c   :  { %v633_v62 = vsel %vm68_vm0, %v629_v61, 0.0 }
 0x13d   :  { %v630_v60 = vsel %vm68_vm0, %v628_v59, 0.0 }
 0x13e   :  { %631 = vadd.xlane.f32.xlu0 %v630_v60 }
 0x142   :  { %634 = vadd.xlane.f32.xlu0 %v633_v62 }
 0x1cb   :  { %v632_v2 = vpop.xlane.xlu0 %631 }
 0x1cc   :  { %v643_v5 = vrot.slane %v632_v2, %v642_v3 }
 0x1cf   :  { %v635_v4 = vpop.xlane.xlu0 %634 }
 0x1d0   :  { %v647_v6 = vrot.slane %v635_v4, %v642_v3 }
 0x1d2   :  { %v649_v9 = vsel %vm648_vm1, %v647_v6, %v643_v5 }
 0x1d3   :  { %v652_v10 = vsel %vm651_vm2, %v649_v9, -inf }
 0x1d4   :  { %653 = vmax.xlane.f32.xlu1 %v652_v10 }
 0x261   :  { %v654_v14 = vpop.xlane.xlu1 %653 }
 0x262   :  { %v659_v15 = vrot.slane %v654_v14, %v658_v12  ;;  %v663_v16 = vrot.slane %v654_v14, %v662_v13 }
 0x264   :  { %v666_v17 = vsub.f32 %v632_v2, %v659_v15  ;;  %v667_v18 = vsub.f32 %v635_v4, %v663_v16 }
 0x266   :  { %v668_v19 = vmul.f32 1.442695, %v666_v17  ;;  %v670_v20 = vmul.f32 1.442695, %v667_v18 }
 0x268   :  { %962 = vpow2.f32 %v668_v19 }
 0x269   :  { %964 = vpow2.f32 %v670_v20 }
 0x272   :  { %v963_v21 = vpop.eup %962 }
 0x273   :  { %v965_v22 = vpop.eup %964  ;;  %675 = vperm.xlu1 %956, %v963_v21  }
 0x274   :  { %678 = vperm.xlu0 %957, %v965_v22  }
 0x2f2   :  { %v676_v23 = vpop.permute.xlu1 %675 }
 0x2f3   :  { %v679_v24 = vpop.permute.xlu0 %678  ;;  %v683_v25 = vrot.slane %v676_v23, %v642_v3 }
 0x2f4   :  { %v687_v26 = vrot.slane %v679_v24, %v642_v3 }
 0x2f6   :  { %v688_v27 = vsel %vm648_vm1, %v687_v26, %v683_v25 }
 0x2f7   :  { %v690_v28 = vsel %vm651_vm2, %v688_v27, 0.0 }
 0x2f8   :  { %691 = vadd.xlane.f32.xlu1 %v690_v28 }
 0x385   :  { %v692_v29 = vpop.xlane.xlu1 %691 }
 0x386   :  { %966 = vrcp.f32 %v692_v29 }
 0x390   :  { %v967_v30 = vpop.eup %966 }
 0x391   :  { %v698_v31 = vrot.slane %v967_v30, %v658_v12  ;;  %v702_v33 = vrot.slane %v967_v30, %v662_v13 }
 0x393   :  { %v705_v32 = vmul.f32 %v963_v21, %v698_v31  ;;  %v706_v34 = vmul.f32 %v965_v22, %v702_v33 }
 0x395   :  { %709 = vperm.xlu0 %957, %v705_v32  }
 0x399   :  { %714 = vperm.xlu0 %957, %v706_v34  }
 0x414   :  { %v710_v35 = vpop.permute.xlu0 %709 }
 0x415   :  { %v717_v36 = vmul.f32 %v710_v35, %v1171_v7  ;;  %v739_v37 = vrot.slane %v710_v35, %v642_v3 }
 0x417   :  { %v719_v38 = vsel %vm68_vm0, %v717_v36, 0.0  ;;  %747 = vst.msk [vmem:[#allocation9] sm:$0x1] %vm746_vm3, %v739_v37 }
 0x418   :  { %v720_v39 = vrot.slane %v719_v38, 4  ;;  %v715_v40 = vpop.permute.xlu0 %714 }
 0x419   :  { %v718_v41 = vmul.f32 %v715_v40, %v1173_v8  ;;  %v743_v42 = vrot.slane %v715_v40, %v642_v3 }
 0x41a   :  { %v721_v43 = vadd.f32 %v720_v39, %v719_v38 }
 0x41b   :  { %v726_v44 = vsel %vm68_vm0, %v718_v41, 0.0  ;;  %748 = vst.msk [vmem:[#allocation9 + $0x1] sm:$0x1] %vm746_vm3, %v743_v42 }
 0x41c   :  { %v722_v45 = vrot.slane %v721_v43, 2  ;;  %v727_v46 = vrot.slane %v726_v44, 4 }
 0x41d   :  { %1045 = shalt.err (!%p1042_p0)
}
 0x41e   :  { %s1046_s11 = scalar_lea.hbm %s1239_s5, 32 }
 0x41f   :  { %p1047_p1 = scmp.ne.s32.totalorder %s1239_s5, %s1046_s11  ;;  %p1050_p2 = scmp.lt.u32.totalorder %s1046_s11, %s1239_s5 }
 0x421   :  { %p1052_p3 = pnand %p1050_p2, %p1047_p1 }
 0x423   :  { %1055 = shalt.err (!%p1052_p3)
}
 0x424   :  { %772 = dma.vmem_to_hbm [thread:$0]  %s767_s29, 32, %s1239_s5, [#allocation10], %s1090_s1, %s1090_s1, %s1091_s17   ;;  %v723_v7 = vadd.f32 %v722_v45, %v721_v43  ;;  %v728_v8 = vadd.f32 %v727_v46, %v726_v44  ;;  %vm733_vm4 = vcmask 253952  }
 0x425   :  { %s1095_s19 = smov [#allocation8]  }
 0x426   :  { %v724_v47 = vrot.slane %v723_v7, 1  ;;  %v729_v48 = vrot.slane %v728_v8, 2  ;;  %s754_s20 = sshll.u32 %s1095_s19, 4  ;;  %s755_s20 = int_to_ptr.vmem [resolvable:$true] %s754_s20 }
 0x427   :  { %s1056_s21 = scalar_lea.vmem %s755_s20, 32  ;;  %p1061_p5 = scmp.lt.s32.totalorder %s755_s20, %s755_s20 }
 0x428   :  { %v730_v49 = vadd.f32 %v729_v48, %v728_v8  ;;  %v725_v50 = vadd.f32 %v724_v47, %v723_v7  ;;  %p1057_p4 = scmp.ne.s32.totalorder %s755_s20, %s1056_s21  ;;  %p1062_p6 = scmp.lt.s32.totalorder %s1056_s21, %s1056_s21 }
 0x42a   :  { %v731_v51 = vrot.slane %v730_v49, 1  ;;  %734 = vst.msk [vmem:[#allocation8] sm:$0x1] %vm733_vm4, %v725_v50  ;;  %p1063_p7 = por %p1062_p6, %p1061_p5 }
 0x42c   :  { %v732_v52 = vadd.f32 %v731_v51, %v730_v49  ;;  %p1064_p8 = pnand %p1063_p7, %p1057_p4 }
 0x42e   :  { %735 = vst.msk [vmem:[#allocation8 + $0x1] sm:$0x1] %vm733_vm4, %v732_v52 }
 0x42f   :  { %1067 = shalt.err (!%p1064_p8)
}
 0x430   :  { %s1068_s23 = scalar_lea.hbm %s1238_s4, 32 }
 0x431   :  { %p1069_p9 = scmp.ne.s32.totalorder %s1238_s4, %s1068_s23  ;;  %p1072_p10 = scmp.lt.u32.totalorder %s1068_s23, %s1238_s4 }
 0x433   :  { %p1074_p11 = pnand %p1072_p10, %p1069_p9 }
 0x435   :  { %1077 = shalt.err (!%p1074_p11)
}
 0x436   :  { %760 = dma.vmem_to_hbm [thread:$0]  %s755_s20, 32, %s1238_s4, [#allocation4], %s1090_s1, %s1090_s1, %s1091_s17  }
 0x437   :  { %1082 = dma.done.wait [#allocation4], 32  }
 0x438   :  { %1083 = vsyncadd [#allocation4], 4294967264 }
 0x439   :  { %1084 = dma.done.wait [#allocation10], 32  }
 0x43a   :  { %1085 = vsyncadd [#allocation10], 4294967264 }
 0x43b   :  { %779 = vsyncpa [#allocation3], 1 }
 0x43c   :  { %780 = vsyncpa [#allocation6], 1 }
 0x43d   :  { %781 = vsyncpa [#allocation4], 1 }
 0x43e   :  { %782 = vsyncpa [#allocation10], 1 }

</bundles_post_ra>
